<compile_context>
chip_gen: v7x
topology: tpu7x:2x2x1
jax: 0.10.0
libtpu: 0.0.40
codegen_flags: <defaults>
</compile_context>

<pallas_src>
import functools

import numpy as np
import jax
import jax.numpy as jnp
from jax import lax
from jax.experimental import pallas as pl
from jax.experimental.pallas import tpu as pltpu


_SMALL_INPUT_BYTES = 256 * 1024   # below this, kernel-launch overhead dominates


def _round_up(x, m):
    return -(-x // m) * m


def _cdiv(a, b):
    return -(-a // b)


# --------------------------------------------------------------------------
# 2-D path: rows on sublanes, reduced feature axis on lanes.
# Grid (row-blocks, feature-blocks); feature axis is the reduction ("arbitrary"),
# lane-partial accumulators live in VMEM scratch and are reduced at the last step.
# --------------------------------------------------------------------------
def _rows_kernel(x1_ref, x2_ref, out_ref, *acc_refs, loss_type, D, Td):
    j = pl.program_id(1)
    last = pl.num_programs(1) - 1
    Tb = x1_ref.shape[0]
    nchunks = Td // 128
    need_mask = (D % Td) != 0          # static: ragged feature tail present

    @pl.when(j == 0)
    def _init():
        for a in acc_refs:
            a[...] = jnp.zeros_like(a)

    # Walk the tile in static 128-lane chunks: pure VALU adds into lane-partial
    # accumulators; the cross-lane (XLU) reduce is deferred to the finalize step.
    for k in range(nchunks):
        sl = slice(k * 128, (k + 1) * 128)
        x1 = x1_ref[:, sl].astype(jnp.float32)
        x2 = x2_ref[:, sl].astype(jnp.float32)
        if need_mask:
            col = j * Td + k * 128 + lax.broadcasted_iota(jnp.int32, (Tb, 128), 1)
            ok = col < D
        if loss_type == "L1":
            v = jnp.abs(x1 - x2)
            acc_refs[0][...] += jnp.where(ok, v, 0.0) if need_mask else v
        elif loss_type == "L2":
            d = x1 - x2
            v = d * d
            acc_refs[0][...] += jnp.where(ok, v, 0.0) if need_mask else v
        else:  # cos
            if need_mask:
                x1 = jnp.where(ok, x1, 0.0)
                x2 = jnp.where(ok, x2, 0.0)
            acc_refs[0][...] += x1 * x2     # running dot
            acc_refs[1][...] += x1 * x1     # running ||x1||^2
            acc_refs[2][...] += x2 * x2     # running ||x2||^2

    @pl.when(j == last)
    def _finalize():
        if loss_type == "cos":
            dot = jnp.sum(acc_refs[0][...], axis=-1, keepdims=True)
            sx = jnp.sum(acc_refs[1][...], axis=-1, keepdims=True)
            sy = jnp.sum(acc_refs[2][...], axis=-1, keepdims=True)
            out_ref[...] = 0.5 * dot / (jnp.sqrt(sx) * jnp.sqrt(sy))
        else:
            out_ref[...] = jnp.sum(acc_refs[0][...], axis=-1, keepdims=True)


def _dis_rows(x1, x2, loss_type):
    """Row-wise reduction kernel: x1, x2 are (R, D); returns (R,) float32."""
    R, D = x1.shape
    R_pad = _round_up(R, 8)

    # Row tile: multiple of 8, modest cap; guarantee >=2 row blocks when possible
    # so v7x megacore (2 TCs) has work on the "parallel" axis.
    Tb = min(256, R_pad)
    if _cdiv(R, Tb) == 1 and R_pad >= 16:
        Tb = _round_up(_cdiv(R_pad, 2), 8)

    # Feature tile: large lane-dense multiple of 128; ragged tail masked in-kernel.
    Td = min(2048, _round_up(D, 128))
    while 4 * Tb * Td * 4 > (32 << 20) and Td > 128:      # 2 inputs x 2 buffers
        Td = max(128, _round_up(Td // 2, 128))

    grid = (_cdiv(R, Tb), _cdiv(D, Td))
    n_acc = 3 if loss_type == "cos" else 1

    in_block = Tb * Td * 4
    vmem_limit = int(min(48 << 20,
                         max(24 << 20,
                             4 * in_block + n_acc * Tb * 128 * 4 + (12 << 20))))

    out = pl.pallas_call(
        functools.partial(_rows_kernel, loss_type=loss_type, D=D, Td=Td),
        out_shape=jax.ShapeDtypeStruct((R, 1), jnp.float32),
        grid=grid,
        in_specs=[
            pl.BlockSpec((Tb, Td), lambda i, j: (i, j)),   # x1 tile
            pl.BlockSpec((Tb, Td), lambda i, j: (i, j)),   # x2 tile
        ],
        # output block constant along the reduction axis; written at finalize only
        out_specs=pl.BlockSpec((Tb, 1), lambda i, j: (i, 0)),
        scratch_shapes=[pltpu.VMEM((Tb, 128), jnp.float32) for _ in range(n_acc)],
        compiler_params=pltpu.CompilerParams(
            dimension_semantics=("parallel", "arbitrary"),
            vmem_limit_bytes=vmem_limit,
        ),
    )(x1, x2)
    return out[:, 0]


# --------------------------------------------------------------------------
# >2-D path (L1 / L2 over dim=1): no transpose. Inputs reshaped (layout-free) to
# (B, C, S); C reduced on sublanes in-kernel; lane-dense (B, 1, S) output.
# --------------------------------------------------------------------------
def _chan_kernel(x1_ref, x2_ref, out_ref, *, loss_type):
    x1 = x1_ref[...].astype(jnp.float32)          # (1, C, Ts)
    x2 = x2_ref[...].astype(jnp.float32)
    d = x1 - x2
    v = jnp.abs(d) if loss_type == "L1" else d * d
    out_ref[...] = jnp.sum(v, axis=1, keepdims=True)   # (1, 1, Ts), lane-dense


def _dis_channels(x1, x2, loss_type):
    B, C = x1.shape[0], x1.shape[1]
    rest = x1.shape[2:]
    S = 1
    for r in rest:
        S *= r
    x1r = x1.reshape(B, C, S)      # layout-free merge of trailing axes
    x2r = x2.reshape(B, C, S)

    Ts = min(2048, _round_up(S, 128))
    while C * Ts * 4 > (2 << 20) and Ts > 128:
        Ts = max(128, _round_up(Ts // 2, 128))
    in_block = C * Ts * 4
    if 4 * in_block > (40 << 20):
        # TODO(synk): channel axis too large for a single VMEM block; would need a
        # C-tiled accumulator grid — fall back to a fused XLA reduction instead.
        return _reference_forward(x1, x2, loss_type)

    grid = (B, _cdiv(S, Ts))
    vmem_limit = int(min(48 << 20, max(24 << 20, 4 * in_block + (12 << 20))))

    out = pl.pallas_call(
        functools.partial(_chan_kernel, loss_type=loss_type),
        out_shape=jax.ShapeDtypeStruct((B, 1, S), jnp.float32),
        grid=grid,
        in_specs=[
            pl.BlockSpec((1, C, Ts), lambda b, s: (b, 0, s)),
            pl.BlockSpec((1, C, Ts), lambda b, s: (b, 0, s)),
        ],
        out_specs=pl.BlockSpec((1, 1, Ts), lambda b, s: (b, 0, s)),
        compiler_params=pltpu.CompilerParams(
            dimension_semantics=("parallel", "parallel"),
            vmem_limit_bytes=vmem_limit,
        ),
    )(x1r, x2r)
    return out.reshape((B,) + rest)


# --------------------------------------------------------------------------
# Public forward + module-style wrapper
# --------------------------------------------------------------------------
def _reference_forward(x1, x2, loss_type):
    """Pure-JAX reference mirroring the PyTorch forward (also the tiny-input path)."""
    if loss_type == "L1":
        return jnp.sum(jnp.abs(x1 - x2), axis=1)
    if loss_type == "L2":
        return jnp.sum((x1 - x2) ** 2, axis=1)
    if loss_type == "cos":
        dot = jnp.sum(x1 * x2, axis=1)
        sx = jnp.sum(x1 * x1, axis=1)
        sy = jnp.sum(x2 * x2, axis=1)
        return 0.5 * dot / (jnp.sqrt(sx) * jnp.sqrt(sy))
    raise ValueError(loss_type)


def dis_forward(x1, x2, loss_type="L1", *, force_pallas=False):
    if x1.shape != x2.shape:
        raise ValueError("x1 and x2 must have the same shape")
    if x1.ndim < 2:
        raise ValueError("inputs must have at least 2 dims (batch, features, ...)")
    if loss_type not in ("L1", "L2", "cos"):
        raise ValueError(f"unknown loss_type {loss_type!r}")
    if loss_type == "cos" and x1.ndim != 2:
        raise ValueError("cosine path requires 2-D (batch, features) inputs")

    # Tiny inputs: launch + pipeline prologue dwarfs the HBM traffic — let XLA fuse.
    in_bytes = x1.size * x1.dtype.itemsize
    if not force_pallas and in_bytes < _SMALL_INPUT_BYTES:
        return _reference_forward(x1, x2, loss_type)

    if x1.ndim == 2:
        return _dis_rows(x1, x2, loss_type)
    return _dis_channels(x1, x2, loss_type)


class Dis:
    """Thin wrapper mirroring the PyTorch module interface (single-call semantics)."""

    def __init__(self, loss_type="L1", batchsize=16):
        self.loss_type = loss_type

    def __call__(self, x1, x2):
        return dis_forward(x1, x2, self.loss_type)


if __name__ == "__main__":
    key = jax.random.PRNGKey(0)
    ks = jax.random.split(key, 8)

    # (batch, features), aligned dims -> no masking path, 2 row blocks (megacore)
    B, D = 16, 256
    x1 = jax.random.normal(ks[0], (B, D), jnp.float32)
    x2 = jax.random.normal(ks[1], (B, D), jnp.float32)
    for lt in ("L1", "L2", "cos"):
        y = jax.block_until_ready(dis_forward(x1, x2, lt, force_pallas=True))
        assert y.shape == (B,)
        np.testing.assert_allclose(np.asarray(y),
                                   np.asarray(_reference_forward(x1, x2, lt)),
                                   rtol=1e-4, atol=1e-5)

    # ragged batch / features + multiple feature blocks -> exercises in-kernel
    # tail masking and the multi-step accumulator
    B2, D2 = 5, 4500
    a = jax.random.normal(ks[2], (B2, D2), jnp.float32)
    b = jax.random.normal(ks[3], (B2, D2), jnp.float32)
    for lt in ("L1", "L2", "cos"):
        y = jax.block_until_ready(dis_forward(a, b, lt, force_pallas=True))
        assert y.shape == (B2,)
        np.testing.assert_allclose(np.asarray(y),
                                   np.asarray(_reference_forward(a, b, lt)),
                                   rtol=1e-4, atol=1e-5)

    # image-like (B, C, H, W): sum over channel dim, lane-dense output, no transpose
    img1 = jax.random.normal(ks[4], (2, 4, 16, 16), jnp.float32)
    img2 = jax.random.normal(ks[5], (2, 4, 16, 16), jnp.float32)
    for lt in ("L1", "L2"):
        y = jax.block_until_ready(dis_forward(img1, img2, lt, force_pallas=True))
        assert y.shape == (2, 16, 16)
        np.testing.assert_allclose(np.asarray(y),
                                   np.asarray(_reference_forward(img1, img2, lt)),
                                   rtol=1e-4, atol=1e-5)

    # ragged spatial size (S not a multiple of 128) + odd channel count
    img3 = jax.random.normal(ks[6], (2, 5, 9, 13), jnp.float32)
    img4 = jax.random.normal(ks[7], (2, 5, 9, 13), jnp.float32)
    y = jax.block_until_ready(dis_forward(img3, img4, "L2", force_pallas=True))
    assert y.shape == (2, 9, 13)
    np.testing.assert_allclose(np.asarray(y),
                               np.asarray(_reference_forward(img3, img4, "L2")),
                               rtol=1e-4, atol=1e-5)

    # small-input bypass path (fused XLA reduction, no kernel launch)
    m = Dis(loss_type="L1")
    y = jax.block_until_ready(m(x1, x2))
    np.testing.assert_allclose(np.asarray(y),
                               np.asarray(_reference_forward(x1, x2, "L1")),
                               rtol=1e-4, atol=1e-5)

    print("KERNEL_OK")
</pallas_src>

<mosaic_0001>
module attributes {stable_mosaic.version = 11 : i64} {
  func.func @_rows_kernel(%arg0: i32, %arg1: i32, %arg2: memref<8x256xf32, #tpu.memory_space<vmem>>, %arg3: memref<8x256xf32, #tpu.memory_space<vmem>>, %arg4: memref<8x1xf32, #tpu.memory_space<vmem>>, %arg5: memref<8x128xf32, #tpu.memory_space<vmem>>) attributes {dimension_semantics = [#tpu.dimension_semantics<parallel>, #tpu.dimension_semantics<arbitrary>], iteration_bounds = array<i64: 2, 1>, scalar_prefetch = 0 : i64, scratch_operands = 1 : i64, tpu.core_type = #tpu.core_type<tc>, window_params = [{transform_indices = @transform_0, window_bounds = array<i64: 8, 256>}, {transform_indices = @transform_1, window_bounds = array<i64: 8, 256>}, {transform_indices = @transform_2, window_bounds = array<i64: 8, 1>}]} {
    %c0_i32 = arith.constant 0 : i32
    %0 = arith.cmpi eq, %arg1, %c0_i32 : i32
    %1 = arith.extui %0 : i1 to i32
    %c0_i32_0 = arith.constant 0 : i32
    %2 = arith.cmpi ne, %1, %c0_i32_0 : i32
    scf.if %2 {
      %cst = arith.constant 0.000000e+00 : f32
      %20 = vector.broadcast %cst : f32 to vector<8x128xf32>
      %c0_17 = arith.constant 0 : index
      %c0_18 = arith.constant 0 : index
      %21 = vector.load %arg5[%c0_17, %c0_18] : memref<8x128xf32, #tpu.memory_space<vmem>>, vector<8x128xf32>
      tpu.vector_store %arg5[%c0_17, %c0_18], %20 {strides = array<i32>} : memref<8x128xf32, #tpu.memory_space<vmem>>, vector<8x128xf32>,
    } else {
    }
    %c0 = arith.constant 0 : index
    %c0_1 = arith.constant 0 : index
    %3 = vector.load %arg2[%c0, %c0_1] : memref<8x256xf32, #tpu.memory_space<vmem>>, vector<8x128xf32>
    %c0_2 = arith.constant 0 : index
    %c0_3 = arith.constant 0 : index
    %4 = vector.load %arg3[%c0_2, %c0_3] : memref<8x256xf32, #tpu.memory_space<vmem>>, vector<8x128xf32>
    %5 = arith.subf %3, %4 : vector<8x128xf32>
    %6 = math.absf %5 : vector<8x128xf32>
    %c0_4 = arith.constant 0 : index
    %c0_5 = arith.constant 0 : index
    %7 = vector.load %arg5[%c0_4, %c0_5] : memref<8x128xf32, #tpu.memory_space<vmem>>, vector<8x128xf32>
    %8 = arith.addf %7, %6 : vector<8x128xf32>
    %c0_6 = arith.constant 0 : index
    %c0_7 = arith.constant 0 : index
    %9 = vector.load %arg5[%c0_6, %c0_7] : memref<8x128xf32, #tpu.memory_space<vmem>>, vector<8x128xf32>
    tpu.vector_store %arg5[%c0_6, %c0_7], %8 {strides = array<i32>} : memref<8x128xf32, #tpu.memory_space<vmem>>, vector<8x128xf32>,
    %c0_8 = arith.constant 0 : index
    %c128 = arith.constant 128 : index
    %10 = vector.load %arg2[%c0_8, %c128] : memref<8x256xf32, #tpu.memory_space<vmem>>, vector<8x128xf32>
    %c0_9 = arith.constant 0 : index
    %c128_10 = arith.constant 128 : index
    %11 = vector.load %arg3[%c0_9, %c128_10] : memref<8x256xf32, #tpu.memory_space<vmem>>, vector<8x128xf32>
    %12 = arith.subf %10, %11 : vector<8x128xf32>
    %13 = math.absf %12 : vector<8x128xf32>
    %c0_11 = arith.constant 0 : index
    %c0_12 = arith.constant 0 : index
    %14 = vector.load %arg5[%c0_11, %c0_12] : memref<8x128xf32, #tpu.memory_space<vmem>>, vector<8x128xf32>
    %15 = arith.addf %14, %13 : vector<8x128xf32>
    %c0_13 = arith.constant 0 : index
    %c0_14 = arith.constant 0 : index
    %16 = vector.load %arg5[%c0_13, %c0_14] : memref<8x128xf32, #tpu.memory_space<vmem>>, vector<8x128xf32>
    tpu.vector_store %arg5[%c0_13, %c0_14], %15 {strides = array<i32>} : memref<8x128xf32, #tpu.memory_space<vmem>>, vector<8x128xf32>,
    %c0_i32_15 = arith.constant 0 : i32
    %17 = arith.cmpi eq, %arg1, %c0_i32_15 : i32
    %18 = arith.extui %17 : i1 to i32
    %c0_i32_16 = arith.constant 0 : i32
    %19 = arith.cmpi ne, %18, %c0_i32_16 : i32
    scf.if %19 {
      %c0_17 = arith.constant 0 : index
      %c0_18 = arith.constant 0 : index
      %20 = vector.load %arg5[%c0_17, %c0_18] : memref<8x128xf32, #tpu.memory_space<vmem>>, vector<8x128xf32>
      %cst = arith.constant dense<0.000000e+00> : vector<8xf32>
      %21 = vector.multi_reduction <add>, %20, %cst [1] : vector<8x128xf32> to vector<8xf32>
      %22 = vector.shape_cast %21 : vector<8xf32> to vector<8x1xf32>
      %c0_19 = arith.constant 0 : index
      %c0_20 = arith.constant 0 : index
      %23 = vector.load %arg4[%c0_19, %c0_20] : memref<8x1xf32, #tpu.memory_space<vmem>>, vector<8x1xf32>
      tpu.vector_store %arg4[%c0_19, %c0_20], %22 {strides = array<i32>} : memref<8x1xf32, #tpu.memory_space<vmem>>, vector<8x1xf32>,
    } else {
    }
    return
  }
  func.func @transform_0(%arg0: i32, %arg1: i32) -> (i32, i32) {
    %c0_i32 = arith.constant 0 : i32
    return %arg0, %arg1 : i32, i32
  }
  func.func @transform_1(%arg0: i32, %arg1: i32) -> (i32, i32) {
    %c0_i32 = arith.constant 0 : i32
    return %arg0, %arg1 : i32, i32
  }
  func.func @transform_2(%arg0: i32, %arg1: i32) -> (i32, i32) {
    %c0_i32 = arith.constant 0 : i32
    %c0_i32_0 = arith.constant 0 : i32
    return %arg0, %c0_i32 : i32, i32
  }
}

</mosaic_0001>

<bundles_post_ra>
// kernel: tpu_custom_call.1
= control target key start
LH: loop header
LB: loop body
LE: loop exit
PB: predicated region body
PF: predicated region fallthrough
CT: control target
= control target key end

     0   :  { %7 = vsyncpa [#allocation4], 0  ;;  %s732_s0 = inlined_call_operand.hbm [shape: f32[16,256], index: 0, kind: input, shape index: {}]   ;;  %s733_s1 = inlined_call_operand.hbm [shape: f32[16,256], index: 1, kind: input, shape index: {}]   ;;  %s734_s2 = inlined_call_operand.vmem [shape: f32[16,1], index: 2, kind: output, shape index: {}]  }
   0x1   :  { %9 = vsyncpa [#allocation4 + $0x1], 0 }
   0x2   :  { %10 = vsyncpa [#allocation6], 0 }
   0x3   :  { %12 = vsyncpa [#allocation6 + $0x1], 0  ;;  %s560_s9 = smov 0   ;;  %s562_s10 = smov 0  }
   0x4   :  { %s564_s11 = smov 0   ;;  %s566_s12 = smov 0  }
   0x5   :  { %s568_s13 = smov 0   ;;  %s570_s14 = smov 0  }
   0x6 LB: > { %s349_s15 = sadd.s32 4294967295, %s541_s14   ;;  %s30_s16 = sadd.s32 1, %s537_s13  ;;  %s541_s14 = sphi %s570_s14, %s18_s14   ;;  %s537_s13 = sphi %s568_s13, %s748_s13   ;;  %s533_s12 = sphi %s566_s12, %s747_s12   ;;  %s529_s11 = sphi %s564_s11, %s746_s11   ;;  %s525_s10 = sphi %s562_s10, %s745_s10   ;;  %s521_s9 = sphi %s560_s9, %s744_s9  }
   0x7   : > { %p32_p0 = scmp.ge.s32.totalorder %s30_s16, 2  ;;  %s39_s17 = sadd.s32 1, %s529_s11 }
   0x8   : > { %p46_p1 = scmp.ne.s32.totalorder %s529_s11, %s525_s10  ;;  %p47_p2 = scmp.eq.s32.totalorder %s541_s14, 0 }
   0x9   : > { %s750_s16 = smov (%p32_p0, %s30_s16), 0  ;;  %p52_p4 = scmp.ne.s32.totalorder %s525_s10, %s521_s9 }
   0xa   : > { %p596_p3 = por %p47_p2, %p46_p1  ;;  %s34_s19 = ssub.s32 %s537_s13, %s750_s16 }
   0xb   : > { %p53_p5 = scmp.eq.s32.totalorder %s349_s15, 0  ;;  %p37_p6 = scmp.eq.s32.totalorder %s34_s19, 0 }
   0xc   : > { %p378_p8 = scmp.lt.s32.totalorder %s541_s14, 2  ;;  %s612_s22 = sand.u32 1, %s529_s11  }
   0xd   : > { %p603_p7 = por %p53_p5, %p52_p4  ;;  %s365_s23 = sshll.u32 %s537_s13, 8 }
   0xe   : > { %s609_s21 = scalar_select %p37_p6, %s529_s11, %s39_s17  }
   0xf   : > { %s737_s20 = scalar_select %p603_p7, 1, 0 }
  0x10   : > { %s353_s24 = sshll.u32 %s612_s22, 4  ;;  %s621_s27 = scalar_lea.hbm %s732_s0, %s365_s23 }
  0x11   : > { %s134_s28 = scalar_lea.vmem [#allocation3], %s353_s24  ;;  %p627_p9 = pnand %p378_p8, %p596_p3 }
  0x12   : > { %s144_s29 = sshll.u32 %s134_s28, 4  ;;  %s131_s3 = scalar_lea.sflag [#allocation4], %s612_s22  ;;  %s631_s29 = int_to_ptr.vmem [resolvable:$true] %s144_s29 }
  0x13   : > { %s427_s4 = scalar_lea.hbm %s621_s27, 256  ;;  %p429_p13 = pneg %p627_p9 }
  0x14   : > { %p428_p12 = scmp.ne.s32.totalorder %s621_s27, %s427_s4  ;;  %s432_s7 = scalar_lea.hbm %s732_s0, 512 }
  0x15   : > { %p433_p2 = scmp.lt.u32.totalorder %s621_s27, %s732_s0  ;;  %p434_p3 = scmp.lt.u32.totalorder %s432_s7, %s427_s4 }
  0x16   : > { %p430_p0 = pnand %p429_p13, %p428_p12  ;;  %p436_p5 = scmp.lt.u32.totalorder %s427_s4, %s621_s27 }
  0x17   : > { %p435_p4 = por %p434_p3, %p433_p2 }
  0x18   : > { %p431_p1 = pneg %p430_p0 }
  0x19   : > { %p437_p6 = por %p436_p5, %p435_p4 }
  0x1b   : > { %p438_p8 = pnand %p437_p6, %p431_p1 }
  0x1d   : > { %441 = shalt.err (!%p438_p8)
}
  0x1e   : > { %s442_s15 = scalar_lea.vmem %s631_s29, 256  ;;  %s543_s17 = smov [#allocation3]  }
  0x1f   : > { %p443_p12 = scmp.ne.s32.totalorder %s631_s29, %s442_s15  ;;  %s447_s18 = sshll.u32 %s543_s17, 4  ;;  %s448_s18 = int_to_ptr.vmem [resolvable:$false] %s447_s18 }
  0x20   : > { %s449_s19 = scalar_lea.vmem %s448_s18, 512  ;;  %p450_p11 = scmp.lt.s32.totalorder %s631_s29, %s448_s18 }
  0x21   : > { %p445_p0 = pnand %p443_p12, %p429_p13  ;;  %p451_p2 = scmp.lt.s32.totalorder %s449_s19, %s442_s15 }
  0x23   : > { %p446_p10 = pneg %p445_p0  ;;  %p452_p3 = por %p451_p2, %p450_p11 }
  0x25   : > { %p453_p4 = pnand %p452_p3, %p446_p10 }
  0x27   : > { %456 = shalt.err (!%p453_p4)
}
  0x28   : > { %374 = dma.hbm_to_vmem [thread:$0]  (!%p627_p9), %s621_s27, 256, %s631_s29, %s131_s3  }
  0x29   : > { %p739_p1 = scmp.lt.s32.totalorder %s541_s14, 3  ;;  %p740_p5 = scmp.ge.s32.totalorder %s541_s14, 1 }
  0x2a   : > { %s674_s4 = scalar_lea.hbm %s733_s1, %s365_s23  ;;  %s155_s5 = scalar_lea.vmem [#allocation5], %s353_s24 }
  0x2b   : > { %p665_p6 = pnand %p740_p5, %p739_p1  ;;  %s165_s6 = sshll.u32 %s155_s5, 4  ;;  %s166_s6 = int_to_ptr.vmem [resolvable:$true] %s165_s6 }
  0x2c   : > { %s152_s27 = scalar_lea.sflag [#allocation6], %s612_s22  ;;  %s457_s29 = scalar_lea.hbm %s674_s4, 256 }
  0x2d   : > { %s741_s25 = scalar_select %p665_p6, 1, 0 }
  0x2e   : > { %p458_p10 = scmp.ne.s32.totalorder %s674_s4, %s457_s29  ;;  %s462_s23 = scalar_lea.hbm %s733_s1, 512 }
  0x2f   : > { %p463_p12 = scmp.lt.u32.totalorder %s674_s4, %s733_s1  ;;  %p464_p0 = scmp.lt.u32.totalorder %s462_s23, %s457_s29 }
  0x30   : > { %p460_p11 = pnand %p458_p10, %p429_p13  ;;  %p466_p3 = scmp.lt.u32.totalorder %s457_s29, %s674_s4 }
  0x31   : > { %p465_p2 = por %p464_p0, %p463_p12 }
  0x32   : > { %p461_p8 = pneg %p460_p11 }
  0x33   : > { %p467_p4 = por %p466_p3, %p465_p2 }
  0x35   : > { %p468_p1 = pnand %p467_p4, %p461_p8 }
  0x37   : > { %471 = shalt.err (!%p468_p1)
}
  0x38   : > { %s472_s22 = scalar_lea.vmem %s166_s6, 256  ;;  %s544_s24 = smov [#allocation5]  }
  0x39   : > { %p473_p5 = scmp.ne.s32.totalorder %s166_s6, %s472_s22  ;;  %s477_s15 = sshll.u32 %s544_s24, 4  ;;  %s478_s15 = int_to_ptr.vmem [resolvable:$false] %s477_s15 }
  0x3a   : > { %s479_s17 = scalar_lea.vmem %s478_s15, 512  ;;  %p480_p7 = scmp.lt.s32.totalorder %s166_s6, %s478_s15 }
  0x3b   : > { %p475_p10 = pnand %p473_p5, %p429_p13  ;;  %p481_p6 = scmp.lt.s32.totalorder %s479_s17, %s472_s22 }
  0x3d   : > { %p476_p11 = pneg %p475_p10  ;;  %p482_p0 = por %p481_p6, %p480_p7 }
  0x3f   : > { %p483_p12 = pnand %p482_p0, %p476_p11 }
  0x41   : > { %486 = shalt.err (!%p483_p12)
}
  0x42   : > { %377 = dma.hbm_to_vmem [thread:$0]  (!%p627_p9), %s674_s4, 256, %s166_s6, %s152_s27  }
  0x43   : > { %p742_p8 = scmp.ne.s32.totalorder %s741_s25, 0 }
  0x44   : > { %s176_s18 = sand.u32 (!%p742_p8), 1, %s525_s10   ;;  %p743_p13 = scmp.ne.s32.totalorder (!%p742_p8), %s737_s20, 0 }
  0x45   : > { %174 = sbr.rel (%p742_p8) target bundleno = 230 (0xe6), region = 28  ;;  %s360_s19 = sshll.u32 (!%p742_p8), %s176_s18, 4 }
  0x46   : > { %s177_s26 = scalar_lea.sflag (!%p742_p8), [#allocation4], %s176_s18  ;;  %s180_s28 = scalar_lea.vmem (!%p742_p8), [#allocation3], %s360_s19 }
  0x4c   : > { %512 = dma.done.wait (%p743_p13), %s177_s26, 256  }
  0x4d   : > { %514 = vsyncadd (%p743_p13), %s177_s26, 4294967040  ;;  %s186_s5 = scalar_lea.sflag [#allocation6], %s176_s18  ;;  %s189_s29 = scalar_lea.vmem [#allocation5], %s360_s19 }
  0x4e   : > { %516 = dma.done.wait (%p743_p13), %s186_s5, 256  }
  0x4f   : > { %518 = vsyncadd (%p743_p13), %s186_s5, 4294967040  ;;  %v225_v0 = vld [vmem:[%s180_s28] sm:$0xff]  ;;  %v232_v2 = vld [vmem:[%s180_s28 + $0x8] sm:$0xff]  ;;  %p216_p7 = scmp.lt.s32.totalorder %s533_s12, 1  ;;  %vm245_vm0 = vcmask 7168  }
  0x50   : > { %v226_v1 = vld [vmem:[%s189_s29] sm:$0xff]  ;;  %v233_v4 = vld [vmem:[%s189_s29 + $0x8] sm:$0xff] }
  0x51   : > { %v227_v3 = vsub.f32 %v225_v0, %v226_v1  ;;  %v234_v5 = vsub.f32 %v232_v2, %v233_v4  ;;  %s752_s12 = smov (!%p216_p7, %s533_s12), 1 }
  0x52   : > { %s362_s30 = sshll.u32 %s752_s12, 3 }
  0x53   : > { %v228_v6 = vand.u32 2147483647, %v227_v3  ;;  %v235_v7 = vand.u32 2147483647, %v234_v5  ;;  %s219_s20 = scalar_lea.vmem %s734_s2, %s362_s30 }
  0x55   : > { %v237_v8 = vadd.f32 %v235_v7, %v228_v6 }
  0x57   : > { %243 = vadd.xlane.f32.xlu0 %v237_v8 }
  0xe4   : > { %v244_v9 = vpop.xlane.xlu0 %243 }
  0xe5   : > { %246 = vst.msk [vmem:[%s219_s20] sm:$0xff] %vm245_vm0, %v244_v9 }
  0xe6 PF: > { %s18_s14 = sadd.s32 1, %s541_s14   ;;  %s744_s9 = smov %s525_s10 }
  0xe7   : > { %p15_p9 = scmp.ge.s32.totalorder %s18_s14, 4   ;;  %s745_s10 = smov %s529_s11 }
  0xe8   : > { %s746_s11 = smov %s609_s21  ;;  %s747_s12 = smov %s537_s13 }
  0xe9   : > { %s748_s13 = smov %s750_s16  ;;  %17 = sbr.rel (!%p15_p9) target bundleno = 6 (0x6), region = 89 }
  0xf0   :  { %266 = vsyncpa [#allocation4], 1 }
  0xf1   :  { %268 = vsyncpa [#allocation4 + $0x1], 1 }
  0xf2   :  { %269 = vsyncpa [#allocation6], 1 }
  0xf3   :  { %271 = vsyncpa [#allocation6 + $0x1], 1 }

</bundles_post_ra>
